<compile_context>
chip_gen: v5e
topology: v5e:2x2
jax: 0.10.0
libtpu: 0.0.40
codegen_flags: <defaults>
</compile_context>

<pallas_src>
import functools

import numpy as np
import jax
import jax.numpy as jnp
from jax import lax
from jax.experimental import pallas as pl
from jax.experimental.pallas import tpu as pltpu


def ntxent_kernel(xb_ref, rhs_t_ref, out_ref, *, temperature, batch, block_rows, n_total):
    """One grid step: rows [g*TM, (g+1)*TM) of the 2B x 2B similarity matrix."""
    inv_t = jnp.float32(1.0 / temperature)

    # (TM, D) pre-normalized f32 row block; fold 1/T before the bf16 cast
    # (O(TM*D) — cheaper than scaling the (TM, 2B) slab when D < 2B).
    lhs = (xb_ref[...] * inv_t).astype(jnp.bfloat16)

    # (TM, 2B) scaled logits against every row. RHS is the resident, pre-transposed
    # (D, 2B) bf16 operand → plain (M,K)x(K,N) MXU matmul, f32 accumulation,
    # no per-step transpose of the full RHS.
    s = jnp.dot(lhs, rhs_t_ref[...], preferred_element_type=jnp.float32)

    # Global row / column ids of this block within the 2B x 2B matrix.
    row = pl.program_id(0) * block_rows + lax.broadcasted_iota(
        jnp.int32, (block_rows, n_total), 0)
    col = lax.broadcasted_iota(jnp.int32, (block_rows, n_total), 1)

    # Positive logit: partner(i) = (i + B) mod 2B. Taken from the bf16 MXU slab so the
    # numerator and denominator use the identical value (as in torch's logits tensor).
    pos_col = jnp.where(row >= batch, row - batch, row + batch)
    pos = jnp.sum(jnp.where(col == pos_col, s, 0.0), axis=-1, keepdims=True)  # (TM, 1)

    # Remove the self column with an iota mask before max / exp — exact and robust
    # for small temperatures (no subtract-the-diagonal cancellation).
    s = jnp.where(col == row, -jnp.inf, s)
    m = jnp.max(s, axis=-1, keepdims=True)                                    # (TM, 1)
    lse = m + jnp.log(jnp.sum(jnp.exp(s - m), axis=-1, keepdims=True))        # (TM, 1)

    # Partial CrossEntropyLoss(reduction='sum') for this row block (label == positive).
    blk = jnp.sum(lse - pos, axis=0, keepdims=True)                           # (1, 1)
    out_ref[...] = blk.reshape(1, 1, 1)


def _vmem_limit_bytes():
    """Scoped VMEM budget from the actual chip (v7x: 64 MiB/TC, v5e/v6e: 128 MiB)."""
    cap = 64 * 1024 * 1024                       # conservative default (v7x per-TC)
    try:
        info = pltpu.get_tpu_info()
        cap = int(getattr(info, "vmem_capacity_bytes", cap) or cap)
    except Exception:
        pass
    return max(32 * 1024 * 1024, min((cap * 3) // 4, 112 * 1024 * 1024))


def _pick_block_rows(n, d, vmem_limit):
    """Largest row tile whose per-step live state fits the generation-aware budget."""
    # Resident bf16 (D, 2B) RHS (x2 for default double-buffering of the constant block).
    resident = 2 * (d * n * 2)
    avail = max(vmem_limit - resident, 1 << 20)
    # ~8 live f32 (TM, 2B) temporaries (logits / masks / exp) + double-buffered
    # f32 (TM, D) LHS block.
    per_row = 8 * 4 * n + 2 * 4 * d
    cap = max(8, avail // per_row)
    for cand in (512, 256, 128, 64, 32, 16, 8):
        if cand <= cap and n % cand == 0:
            return cand
    return n   # tiny inputs: one block covering all rows (block dim == full dim is legal)


def ntxent_loss2(zis, zjs, *, batch_size, temperature):
    """Pallas equivalent of NTXentLoss2.forward (use_cosine_similarity=True)."""
    b, d = zis.shape
    assert zjs.shape == (b, d) and b == batch_size
    n = 2 * b

    # One-time (hoisted) prep: normalize cat([zjs, zis]) once; keep an f32 copy for the
    # tiled LHS blocks and a bf16, pre-transposed (D, 2B) copy as the resident MXU RHS.
    reps = jnp.concatenate([zjs, zis], axis=0).astype(jnp.float32)       # (N, D)
    ssq = jnp.sum(reps * reps, axis=-1, keepdims=True)
    # rsqrt(max(ssq, 1e-16)) == 1 / max(||x||, 1e-8): same eps semantics as the torch path.
    xn = reps * lax.rsqrt(jnp.maximum(ssq, jnp.float32(1e-16)))          # (N, D) f32
    xn_t_bf = xn.T.astype(jnp.bfloat16)                                  # (D, N) bf16

    vmem_limit = _vmem_limit_bytes()
    tm = _pick_block_rows(n, d, vmem_limit)
    grid_blocks = n // tm

    kernel = functools.partial(
        ntxent_kernel, temperature=float(temperature), batch=b,
        block_rows=tm, n_total=n)

    per_block = pl.pallas_call(
        kernel,
        out_shape=jax.ShapeDtypeStruct((grid_blocks, 1, 1), jnp.float32),
        grid_spec=pltpu.PrefetchScalarGridSpec(
            num_scalar_prefetch=0,
            grid=(grid_blocks,),
            in_specs=[pl.BlockSpec((tm, d), lambda g: (g, 0)),    # f32 LHS row block
                      pl.BlockSpec((d, n), lambda g: (0, 0))],    # bf16 resident RHS^T
            out_specs=pl.BlockSpec((1, 1, 1), lambda g: (g, 0, 0))),
        compiler_params=pltpu.CompilerParams(
            dimension_semantics=("parallel",),
            vmem_limit_bytes=int(vmem_limit)),
        cost_estimate=pl.CostEstimate(
            flops=2 * n * n * d + 10 * n * n,
            transcendentals=n * n + 2 * n,
            bytes_accessed=4 * n * d + 2 * n * d + 4 * grid_blocks),
    )(xn, xn_t_bf)

    # CrossEntropyLoss(reduction='sum') over the 2B rows, then / (2B) — as in torch.
    return jnp.sum(per_block) / n


def ntxent_ref_numpy(zis, zjs, batch_size, temperature):
    """Literal transcription of the PyTorch forward (cosine-similarity path), float64."""
    reps = np.concatenate([np.asarray(zjs), np.asarray(zis)], axis=0).astype(np.float64)
    n = 2 * batch_size
    norms = np.linalg.norm(reps, axis=-1, keepdims=True)
    xn = reps / np.maximum(norms, 1e-8)
    sim = xn @ xn.T
    l_pos = np.diag(sim, batch_size)
    r_pos = np.diag(sim, -batch_size)
    positives = np.concatenate([l_pos, r_pos]).reshape(n, 1)
    mask = (1 - (np.eye(n) + np.eye(n, k=batch_size) + np.eye(n, k=-batch_size))).astype(bool)
    negatives = sim[mask].reshape(n, -1)
    logits = np.concatenate([positives, negatives], axis=1) / temperature
    m = logits.max(-1, keepdims=True)
    lse = m[:, 0] + np.log(np.exp(logits - m).sum(-1))
    loss = np.sum(lse - logits[:, 0])   # CrossEntropyLoss(sum) with labels == 0
    return loss / n


if __name__ == "__main__":
    # Shapes consistent with the module's forward: zis/zjs are (batch_size, AR_hid_dim).
    # NOTE: the projection_head defined in __init__ is never used in forward, so it is
    # intentionally not instantiated here.
    batch_size = 4
    feat_dim = 32          # == config.AR_hid_dim
    temperature = 0.2

    key = jax.random.PRNGKey(0)
    k1, k2, k3, k4 = jax.random.split(key, 4)
    zis = jax.random.normal(k1, (batch_size, feat_dim), dtype=jnp.float32)
    zjs = jax.random.normal(k2, (batch_size, feat_dim), dtype=jnp.float32)

    loss = jax.block_until_ready(
        ntxent_loss2(zis, zjs, batch_size=batch_size, temperature=temperature))
    ref = ntxent_ref_numpy(zis, zjs, batch_size, temperature)
    # bf16 MXU operands (with f32 accumulation) give ~1e-3-level logit error -> loose tol.
    np.testing.assert_allclose(np.asarray(loss), ref, rtol=2e-2, atol=2e-2)

    # Second check at a size that exercises the tiled grid (3 row blocks of 128).
    bs2, d2 = 192, 64
    zis2 = jax.random.normal(k3, (bs2, d2), dtype=jnp.float32)
    zjs2 = jax.random.normal(k4, (bs2, d2), dtype=jnp.float32)
    loss2 = jax.block_until_ready(
        ntxent_loss2(zis2, zjs2, batch_size=bs2, temperature=temperature))
    ref2 = ntxent_ref_numpy(zis2, zjs2, bs2, temperature)
    np.testing.assert_allclose(np.asarray(loss2), ref2, rtol=2e-2, atol=2e-2)

    # TODO(synk): the use_cosine_similarity=False (_dot_simililarity) branch assumes 3-D
    # inputs (permute(0,2,1)) and is not exercised for 2-D representations; only the
    # cosine path is implemented here.
    print("KERNEL_OK")
</pallas_src>

<mosaic_0001>
module attributes {stable_mosaic.version = 11 : i64} {
  func.func @ntxent_kernel(%arg0: i32, %arg1: memref<8x32xf32, #tpu.memory_space<vmem>>, %arg2: memref<32x8xbf16, #tpu.memory_space<vmem>>, %arg3: memref<1x1x1xf32, #tpu.memory_space<vmem>>) attributes {dimension_semantics = [#tpu.dimension_semantics<parallel>], iteration_bounds = array<i64: 1>, scalar_prefetch = 0 : i64, scratch_operands = 0 : i64, tpu.core_type = #tpu.core_type<tc>, window_params = [{transform_indices = @transform_0, window_bounds = array<i64: 8, 32>}, {pipeline_mode = #tpu.pipeline_mode<synchronous>, transform_indices = @transform_1, window_bounds = array<i64: 32, 8>}, {transform_indices = @transform_2, window_bounds = array<i64: 1, 1, 1>}]} {
    %c0 = arith.constant 0 : index
    %c0_0 = arith.constant 0 : index
    %0 = vector.load %arg1[%c0, %c0_0] : memref<8x32xf32, #tpu.memory_space<vmem>>, vector<8x32xf32>
    %cst = arith.constant 5.000000e+00 : f32
    %1 = vector.broadcast %cst : f32 to vector<8x32xf32>
    %2 = arith.mulf %0, %1 : vector<8x32xf32>
    %3 = arith.truncf %2 : vector<8x32xf32> to vector<8x32xbf16>
    %c0_1 = arith.constant 0 : index
    %c0_2 = arith.constant 0 : index
    %4 = vector.load %arg2[%c0_1, %c0_2] : memref<32x8xbf16, #tpu.memory_space<vmem>>, vector<32x8xbf16>
    %cst_3 = arith.constant dense<0.000000e+00> : vector<8x8xf32>
    %5 = tpu.matmul %3, %4, %cst_3 {dimension_numbers = #tpu.dot_dimension_numbers<[1], [0], [0], [1], [0, 0, 1, 1], [], []>} : vector<8x32xbf16>, vector<32x8xbf16>, vector<8x8xf32> -> vector<8x8xf32>
    %c8_i32 = arith.constant 8 : i32
    %6 = arith.muli %arg0, %c8_i32 : i32
    %7 = tpu.iota {dimensions = array<i32: 0>} : vector<8x8xi32>
    %8 = vector.broadcast %6 : i32 to vector<8x8xi32>
    %9 = arith.addi %8, %7 : vector<8x8xi32>
    %10 = tpu.iota {dimensions = array<i32: 1>} : vector<8x8xi32>
    %c4_i32 = arith.constant 4 : i32
    %11 = vector.broadcast %c4_i32 : i32 to vector<8x8xi32>
    %12 = arith.cmpi sge, %9, %11 : vector<8x8xi32>
    %c4_i32_4 = arith.constant 4 : i32
    %13 = vector.broadcast %c4_i32_4 : i32 to vector<8x8xi32>
    %14 = arith.subi %9, %13 : vector<8x8xi32>
    %c4_i32_5 = arith.constant 4 : i32
    %15 = vector.broadcast %c4_i32_5 : i32 to vector<8x8xi32>
    %16 = arith.addi %9, %15 : vector<8x8xi32>
    %17 = arith.select %12, %14, %16 : vector<8x8xi1>, vector<8x8xi32>
    %18 = arith.cmpi eq, %10, %17 : vector<8x8xi32>
    %cst_6 = arith.constant 0.000000e+00 : f32
    %19 = vector.broadcast %cst_6 : f32 to vector<8x8xf32>
    %20 = arith.select %18, %5, %19 : vector<8x8xi1>, vector<8x8xf32>
    %cst_7 = arith.constant dense<0.000000e+00> : vector<8xf32>
    %21 = vector.multi_reduction <add>, %20, %cst_7 [1] : vector<8x8xf32> to vector<8xf32>
    %22 = vector.shape_cast %21 : vector<8xf32> to vector<8x1xf32>
    %23 = arith.cmpi eq, %10, %9 : vector<8x8xi32>
    %cst_8 = arith.constant 0xFF800000 : f32
    %24 = vector.broadcast %cst_8 : f32 to vector<8x8xf32>
    %25 = arith.select %23, %24, %5 : vector<8x8xi1>, vector<8x8xf32>
    %cst_9 = arith.constant dense<0xFF800000> : vector<8xf32>
    %26 = vector.multi_reduction <maximumf>, %25, %cst_9 [1] : vector<8x8xf32> to vector<8xf32>
    %27 = vector.shape_cast %26 : vector<8xf32> to vector<8x1xf32>
    %28 = vector.broadcast %27 : vector<8x1xf32> to vector<8x8xf32>
    %29 = arith.subf %25, %28 : vector<8x8xf32>
    %30 = math.exp %29 : vector<8x8xf32>
    %cst_10 = arith.constant dense<0.000000e+00> : vector<8xf32>
    %31 = vector.multi_reduction <add>, %30, %cst_10 [1] : vector<8x8xf32> to vector<8xf32>
    %32 = vector.shape_cast %31 : vector<8xf32> to vector<8x1xf32>
    %33 = math.log %32 : vector<8x1xf32>
    %34 = arith.addf %27, %33 : vector<8x1xf32>
    %35 = arith.subf %34, %22 : vector<8x1xf32>
    %cst_11 = arith.constant dense<0.000000e+00> : vector<1xf32>
    %36 = vector.multi_reduction <add>, %35, %cst_11 [0] : vector<8x1xf32> to vector<1xf32>
    %37 = vector.shape_cast %36 : vector<1xf32> to vector<1x1xf32>
    %38 = vector.shape_cast %37 : vector<1x1xf32> to vector<1x1x1xf32>
    %c0_12 = arith.constant 0 : index
    %c0_13 = arith.constant 0 : index
    %c0_14 = arith.constant 0 : index
    %39 = vector.load %arg3[%c0_12, %c0_13, %c0_14] : memref<1x1x1xf32, #tpu.memory_space<vmem>>, vector<1x1x1xf32>
    tpu.vector_store %arg3[%c0_12, %c0_13, %c0_14], %38 {strides = array<i32>} : memref<1x1x1xf32, #tpu.memory_space<vmem>>, vector<1x1x1xf32>,
    return
  }
  func.func @transform_0(%arg0: i32) -> (i32, i32) {
    %c0_i32 = arith.constant 0 : i32
    %c0_i32_0 = arith.constant 0 : i32
    return %arg0, %c0_i32 : i32, i32
  }
  func.func @transform_1(%arg0: i32) -> (i32, i32) {
    %c0_i32 = arith.constant 0 : i32
    %c0_i32_0 = arith.constant 0 : i32
    %c0_i32_1 = arith.constant 0 : i32
    return %c0_i32, %c0_i32_0 : i32, i32
  }
  func.func @transform_2(%arg0: i32) -> (i32, i32, i32) {
    %c0_i32 = arith.constant 0 : i32
    %c0_i32_0 = arith.constant 0 : i32
    %c0_i32_1 = arith.constant 0 : i32
    return %arg0, %c0_i32, %c0_i32_0 : i32, i32, i32
  }
}

</mosaic_0001>

<bundles_post_ra>
// kernel: tpu_custom_call.1
= control target key start
LH: loop header
LB: loop body
LE: loop exit
PB: predicated region body
PF: predicated region fallthrough
CT: control target
= control target key end

     0   :  { %s176_s0 = inlined_call_operand.vmem [shape: f32[8,32], index: 0, kind: input, shape index: {}]   ;;  %s177_s1 = inlined_call_operand.vmem [shape: bf16[32,8], index: 1, kind: input, shape index: {}]   ;;  %s178_s2 = inlined_call_operand.hbm [shape: f32[1,1,1], index: 2, kind: output, shape index: {}]  }
   0x1   :  { %v116_v0 = vld [vmem:[%s177_s1 + $0x8] sm:$0xff]  ;;  %v13_v1 = vld [vmem:[%s176_s0] sm:$0xff] }
   0x2   :  { %v14_v2 = vmul.f32 5.0, %v13_v1 }
   0x3   :  { %7 = vsyncpa [#allocation3], 0  ;;  %42 = vmatpush.bf16.msra.mxu0 %v116_v0  ;;  %v115_v3 = vld [vmem:[%s177_s1] sm:$0xff]  ;;  %vm32_vm0 = vcmask 261120   ;;  %v50_v5 = vlaneseq  ;;  %vm62_vm4 = vcmask 64512   ;;  %s148_s0 = smov [#allocation2]  }
   0x4   :  { %v15_v4 = vpack.c.bf16 %v14_v2, %v14_v2  ;;  %s94_s1 = sshll.u32 %s148_s0, 4  ;;  %s96_s17 = sshll.u32 %s178_s2, 4  ;;  %vm87_vm5 = vcmask 0   ;;  %s95_s1 = int_to_ptr.vmem [resolvable:$true] %s94_s1  ;;  %s97_s17 = int_to_ptr.hbm [resolvable:$true] %s96_s17 }
   0x5   :  { %v51_v6 = vshrl.u32 %v50_v5, 7  ;;  %v55_v9 = vand.u32 127, %v50_v5 }
   0x7   :  { %43 = vmatpush.bf16.msra.mxu0 %v115_v3  ;;  %v114_v7 = vadd.s32 4294967292, %v51_v6  ;;  %v58_v8 = vadd.s32 4, %v51_v6  ;;  %vm56_vm1 = vcmp.ge.s32.totalorder %v51_v6, 4  ;;  %vm66_vm2 = vcmp.eq.s32.totalorder %v55_v9, %v51_v6 }
   0x9   :  { %v59_v10 = vsel %vm56_vm1, %v114_v7, %v58_v8 }
   0xa   :  { %113 = vmatmul.msk.bf16.vlgmr.msra.gmra.mxu0 %vm32_vm0, %v15_v4  ;;  %vm60_vm3 = vcmp.eq.s32.totalorder %v55_v9, %v59_v10 }
  0x87   :  { %v45_v11 = vpop.f32.mrf.mxu0 }
  0x88   :  { %v67_v12 = vsel %vm66_vm2, -inf, %v45_v11  ;;  %v61_v13 = vsel %vm60_vm3, %v45_v11, 0.0 }
  0x89   :  { %v68_v14 = vsel %vm62_vm4, %v67_v12, -inf  ;;  %v63_v15 = vsel %vm62_vm4, %v61_v13, 0.0 }
  0x8a   :  { %69 = vmax.xlane.f32.xlu0 %v68_v14  ;;  %64 = vadd.xlane.f32.xlu1 %v63_v15 }
  0x8f   :  { %v47_v16 = vpop.f32.mrf.mxu0 }
  0xfd   :  { %v70_v17 = vpop.xlane.xlu0 %69  ;;  %v65_v26 = vpop.xlane.xlu1 %64 }
  0xfe   :  { %v71_v18 = vsub.f32 %v67_v12, %v70_v17 }
 0x100   :  { %v72_v19 = vmul.f32 1.442695, %v71_v18 }
 0x102   :  { %118 = vpow2.f32 %v72_v19 }
 0x108   :  { %v119_v20 = vpop.eup %118 }
 0x109   :  { %v74_v21 = vsel %vm62_vm4, %v119_v20, 0.0 }
 0x10a   :  { %75 = vadd.xlane.f32.xlu0 %v74_v21 }
 0x17d   :  { %v76_v22 = vpop.xlane.xlu0 %75 }
 0x17e   :  { %120 = vlog2.f32 %v76_v22 }
 0x184   :  { %v121_v23 = vpop.eup %120 }
 0x185   :  { %v78_v24 = vmul.f32 0.6931472, %v121_v23 }
 0x187   :  { %v79_v25 = vadd.f32 %v78_v24, %v70_v17 }
 0x189   :  { %v80_v27 = vsub.f32 %v79_v25, %v65_v26 }
 0x18b   :  { %v81_v28 = vrot.slane %v80_v27, 4 }
 0x18d   :  { %v82_v29 = vadd.f32 %v81_v28, %v80_v27 }
 0x18f   :  { %v83_v30 = vrot.slane %v82_v29, 2 }
 0x191   :  { %v84_v31 = vadd.f32 %v83_v30, %v82_v29 }
 0x193   :  { %v85_v32 = vrot.slane %v84_v31, 1 }
 0x195   :  { %v86_v33 = vadd.f32 %v85_v32, %v84_v31 }
 0x197   :  { %88 = vst.msk [vmem:[#allocation2] sm:$0x1] %vm87_vm5, %v86_v33 }
 0x198   :  { %99 = dma.vmem_to_hbm [thread:$0]  %s95_s1, 16, %s97_s17, [#allocation3]  }
 0x199   :  { %146 = dma.done.wait [#allocation3], 16  }
 0x19a   :  { %147 = vsyncadd [#allocation3], 4294967280 }
 0x19b   :  { %104 = vsyncpa [#allocation3], 1 }

</bundles_post_ra>
